<compile_context>
chip_gen: v7x
topology: tpu7x:2x2x1
jax: 0.10.0
libtpu: 0.0.40
codegen_flags: <defaults>
</compile_context>

<pallas_src>
import functools

import jax
import jax.numpy as jnp
from jax import lax
from jax.experimental import pallas as pl
from jax.experimental.pallas import tpu as pltpu

EPS = 1e-5


def _cdiv(a, b):
    return -(-a // b)


def _round_up(a, b):
    return _cdiv(a, b) * b


def _ln_kernel(*refs, inv_d, has_bias, packed):
    """LayerNorm kernel body.

    x_ref  : (tile_rows, P) tile; when packed, each 128-lane row holds
             k = P // d independent logical rows of length d.
    w_ref  : (1, P) weight (tiled k times along lanes when packed).
    b_ref  : (1, P) bias (only when has_bias).
    seg_ref: (P, P) block-diagonal ones, pre-scaled by 1/d (only when packed);
             constant index_map -> resident in VMEM across grid steps.
    o_ref  : (tile_rows, P) output tile.
    """
    refs = list(refs)
    x_ref = refs.pop(0)
    w_ref = refs.pop(0)
    b_ref = refs.pop(0) if has_bias else None
    seg_ref = refs.pop(0) if packed else None
    o_ref = refs.pop(0)

    x = x_ref[...].astype(jnp.float32)

    if packed:
        # Two independent segment-sum matmuls on the otherwise-idle MXU; no
        # VPU dependency between them, so the MXU pipeline stays full.
        seg = seg_ref[...]                                   # (P, P) f32 * 1/d
        mean = jnp.dot(x, seg, preferred_element_type=jnp.float32)
        mean_sq = jnp.dot(x * x, seg, preferred_element_type=jnp.float32)
    else:
        # Hidden dim is lane-dense already: two independent XLU reductions.
        mean = jnp.sum(x, axis=-1, keepdims=True) * inv_d
        mean_sq = jnp.sum(x * x, axis=-1, keepdims=True) * inv_d

    var = jnp.maximum(mean_sq - mean * mean, 0.0)
    y = (x - mean) * lax.rsqrt(var + EPS)
    y = y * w_ref[...].astype(jnp.float32)
    if has_bias:
        y = y + b_ref[...].astype(jnp.float32)
    o_ref[...] = y.astype(o_ref.dtype)


@functools.partial(jax.jit, static_argnames=("tile_rows",))
def layer_norm(x, weight, bias=None, *, tile_rows=None):
    """LayerNorm over the last dim of x, with weight and optional bias."""
    orig_shape = x.shape
    d = orig_shape[-1]
    rows = 1
    for s in orig_shape[:-1]:
        rows *= s

    # Lane-dense packing factor for small hidden dims, only when it needs no
    # padding copy (rows divisible by k).
    # TODO(synk): extend lane-dense packing to d that are not divisors of 128.
    if d < 128 and 128 % d == 0 and rows % (128 // d) == 0:
        k = 128 // d
    else:
        k = 1
    p = k * d
    packed_rows = rows // k
    packed = k > 1

    itemsize = jnp.dtype(x.dtype).itemsize
    sublane = max(8, 32 // itemsize)      # 8 for f32, 16 for bf16, 32 for int8

    if tile_rows is None:
        # ~4 MiB DMA tiles: double-buffered in/out plus ~4 tile-sized f32
        # intermediates of the kernel body stay well under v7x's 64 MiB VMEM.
        tile_budget_bytes = 4 * 1024 * 1024
        tr = max(sublane,
                 (tile_budget_bytes // (p * itemsize) // sublane) * sublane)
        tr = min(tr, 4096 if packed else 8192)
        # Aim for >= ~8 grid steps (real software pipelining; >= 4 per core on
        # v7x megacore) as long as tiles stay >= ~1 MiB.
        min_tile_rows = max(
            sublane, _round_up(_cdiv(1024 * 1024, p * itemsize), sublane))
        if _cdiv(packed_rows, tr) < 8:
            tr = max(min_tile_rows, _round_up(_cdiv(packed_rows, 8), sublane))
        tr = min(tr, _round_up(packed_rows, sublane))
        tile_rows = max(sublane, tr)
    tile_rows = max(sublane, (tile_rows // sublane) * sublane)

    # No jnp.pad: the trailing partial block is handled by Pallas (padded read,
    # masked write).  Garbage in the padded rows only affects dropped stores.
    grid = (_cdiv(packed_rows, tile_rows),)

    xp = x.reshape(packed_rows, p)        # free relabel of contiguous HBM
    wp = jnp.tile(weight.reshape(1, d), (1, k)) if packed else weight.reshape(1, d)
    has_bias = bias is not None

    in_specs = [
        pl.BlockSpec((tile_rows, p), lambda i: (i, 0)),
        pl.BlockSpec((1, p), lambda i: (0, 0)),
    ]
    args = [xp, wp]
    if has_bias:
        bp = jnp.tile(bias.reshape(1, d), (1, k)) if packed else bias.reshape(1, d)
        in_specs.append(pl.BlockSpec((1, p), lambda i: (0, 0)))
        args.append(bp)
    if packed:
        # Block-diagonal segment-sum matrix, pre-scaled by 1/d, built once in
        # the wrapper (constant-folded by XLA) and resident across grid steps.
        lane = jnp.arange(p, dtype=jnp.int32) // d
        seg = (lane[:, None] == lane[None, :]).astype(jnp.float32) * (1.0 / d)
        in_specs.append(pl.BlockSpec((p, p), lambda i: (0, 0)))
        args.append(seg)

    out = pl.pallas_call(
        functools.partial(_ln_kernel, inv_d=1.0 / d, has_bias=has_bias,
                          packed=packed),
        out_shape=jax.ShapeDtypeStruct((packed_rows, p), x.dtype),
        grid_spec=pltpu.PrefetchScalarGridSpec(
            num_scalar_prefetch=0,
            grid=grid,
            in_specs=in_specs,
            out_specs=pl.BlockSpec((tile_rows, p), lambda i: (i, 0)),
        ),
        compiler_params=pltpu.CompilerParams(
            # Row axis is embarrassingly parallel -> eligible for megacore
            # sharding on v7x; measured neutral on single-TC v5e/v6e.
            dimension_semantics=("parallel",),
            vmem_limit_bytes=48 * 1024 * 1024,
        ),
    )(*args)

    return out.reshape(orig_shape)


def _reference_layer_norm(x, weight, bias):
    xf = x.astype(jnp.float32)
    mean = jnp.mean(xf, axis=-1, keepdims=True)
    var = jnp.mean((xf - mean) ** 2, axis=-1, keepdims=True)
    y = (xf - mean) * lax.rsqrt(var + EPS)
    y = y * weight
    if bias is not None:
        y = y + bias
    return y.astype(x.dtype)


if __name__ == "__main__":
    key = jax.random.PRNGKey(0)
    k1, k2, k3, k4 = jax.random.split(key, 4)

    # Module-implied layout: (batch, seq, hidden), normalize over hidden.
    batch, seq, hidden = 2, 8, 32
    x = jax.random.normal(k1, (batch, seq, hidden), dtype=jnp.float32)
    weight = jnp.ones((hidden,), dtype=jnp.float32) * 1.5
    bias = jnp.zeros((hidden,), dtype=jnp.float32) + 0.25

    # bias=True, packed lane-dense path (rows divisible by 128 // hidden).
    out = layer_norm(x, weight, bias)
    jax.block_until_ready(out)
    ref = _reference_layer_norm(x, weight, bias)
    assert jnp.allclose(out, ref, atol=2e-5, rtol=2e-5), "mismatch (bias=True)"

    # bias=False path (no bias input / DMA / add).
    out_nb = layer_norm(x, weight, None)
    jax.block_until_ready(out_nb)
    ref_nb = _reference_layer_norm(x, weight, None)
    assert jnp.allclose(out_nb, ref_nb, atol=2e-5, rtol=2e-5), "mismatch (bias=False)"

    # hidden >= 128 path with a ragged trailing block (14 rows, 16-row tile).
    b2, s2, h2 = 2, 7, 256
    x_big = jax.random.normal(k2, (b2, s2, h2), dtype=jnp.float32)
    w_big = 1.0 + 0.1 * jax.random.normal(k3, (h2,), dtype=jnp.float32)
    out_big = layer_norm(x_big, w_big, None)
    jax.block_until_ready(out_big)
    ref_big = _reference_layer_norm(x_big, w_big, None)
    assert jnp.allclose(out_big, ref_big, atol=2e-5, rtol=2e-5), "mismatch (hidden=256)"

    # Small hidden dim where rows % (128 // hidden) != 0 -> unpacked fallback,
    # also exercises the masked trailing block (15 rows, 16-row tile).
    b3, s3, h3 = 3, 5, 32
    x_odd = jax.random.normal(k4, (b3, s3, h3), dtype=jnp.float32)
    out_odd = layer_norm(x_odd, weight, bias)
    jax.block_until_ready(out_odd)
    ref_odd = _reference_layer_norm(x_odd, weight, bias)
    assert jnp.allclose(out_odd, ref_odd, atol=2e-5, rtol=2e-5), "mismatch (odd rows)"

    print("KERNEL_OK")
</pallas_src>

<mosaic_0001>
module attributes {stable_mosaic.version = 11 : i64} {
  func.func @_ln_kernel(%arg0: i32, %arg1: memref<8x128xf32, #tpu.memory_space<vmem>>, %arg2: memref<1x128xf32, #tpu.memory_space<vmem>>, %arg3: memref<1x128xf32, #tpu.memory_space<vmem>>, %arg4: memref<128x128xf32, #tpu.memory_space<vmem>>, %arg5: memref<8x128xf32, #tpu.memory_space<vmem>>) attributes {dimension_semantics = [#tpu.dimension_semantics<parallel>], iteration_bounds = array<i64: 1>, scalar_prefetch = 0 : i64, scratch_operands = 0 : i64, tpu.core_type = #tpu.core_type<tc>, window_params = [{transform_indices = @transform_0, window_bounds = array<i64: 8, 128>}, {pipeline_mode = #tpu.pipeline_mode<synchronous>, transform_indices = @transform_1, window_bounds = array<i64: 1, 128>}, {pipeline_mode = #tpu.pipeline_mode<synchronous>, transform_indices = @transform_2, window_bounds = array<i64: 1, 128>}, {pipeline_mode = #tpu.pipeline_mode<synchronous>, transform_indices = @transform_3, window_bounds = array<i64: 128, 128>}, {transform_indices = @transform_4, window_bounds = array<i64: 8, 128>}]} {
    %c0 = arith.constant 0 : index
    %c0_0 = arith.constant 0 : index
    %0 = vector.load %arg1[%c0, %c0_0] : memref<8x128xf32, #tpu.memory_space<vmem>>, vector<8x128xf32>
    %c0_1 = arith.constant 0 : index
    %c0_2 = arith.constant 0 : index
    %1 = vector.load %arg4[%c0_1, %c0_2] : memref<128x128xf32, #tpu.memory_space<vmem>>, vector<128x128xf32>
    %cst = arith.constant dense<0.000000e+00> : vector<8x128xf32>
    %2 = tpu.matmul %0, %1, %cst {dimension_numbers = #tpu.dot_dimension_numbers<[1], [0], [0], [1], [0, 0, 1, 1], [], []>} : vector<8x128xf32>, vector<128x128xf32>, vector<8x128xf32> -> vector<8x128xf32>
    %3 = arith.mulf %0, %0 : vector<8x128xf32>
    %cst_3 = arith.constant dense<0.000000e+00> : vector<8x128xf32>
    %4 = tpu.matmul %3, %1, %cst_3 {dimension_numbers = #tpu.dot_dimension_numbers<[1], [0], [0], [1], [0, 0, 1, 1], [], []>} : vector<8x128xf32>, vector<128x128xf32>, vector<8x128xf32> -> vector<8x128xf32>
    %5 = arith.mulf %2, %2 : vector<8x128xf32>
    %6 = arith.subf %4, %5 : vector<8x128xf32>
    %cst_4 = arith.constant 0.000000e+00 : f32
    %7 = vector.broadcast %cst_4 : f32 to vector<8x128xf32>
    %8 = arith.maximumf %6, %7 : vector<8x128xf32>
    %9 = arith.subf %0, %2 : vector<8x128xf32>
    %cst_5 = arith.constant 9.99999974E-6 : f32
    %10 = vector.broadcast %cst_5 : f32 to vector<8x128xf32>
    %11 = arith.addf %8, %10 : vector<8x128xf32>
    %12 = math.rsqrt %11 : vector<8x128xf32>
    %13 = arith.mulf %9, %12 : vector<8x128xf32>
    %c0_6 = arith.constant 0 : index
    %c0_7 = arith.constant 0 : index
    %14 = vector.load %arg2[%c0_6, %c0_7] : memref<1x128xf32, #tpu.memory_space<vmem>>, vector<1x128xf32>
    %15 = vector.broadcast %14 : vector<1x128xf32> to vector<8x128xf32>
    %16 = arith.mulf %13, %15 : vector<8x128xf32>
    %c0_8 = arith.constant 0 : index
    %c0_9 = arith.constant 0 : index
    %17 = vector.load %arg3[%c0_8, %c0_9] : memref<1x128xf32, #tpu.memory_space<vmem>>, vector<1x128xf32>
    %18 = vector.broadcast %17 : vector<1x128xf32> to vector<8x128xf32>
    %19 = arith.addf %16, %18 : vector<8x128xf32>
    %c0_10 = arith.constant 0 : index
    %c0_11 = arith.constant 0 : index
    %20 = vector.load %arg5[%c0_10, %c0_11] : memref<8x128xf32, #tpu.memory_space<vmem>>, vector<8x128xf32>
    tpu.vector_store %arg5[%c0_10, %c0_11], %19 {strides = array<i32>} : memref<8x128xf32, #tpu.memory_space<vmem>>, vector<8x128xf32>,
    return
  }
  func.func @transform_0(%arg0: i32) -> (i32, i32) {
    %c0_i32 = arith.constant 0 : i32
    %c0_i32_0 = arith.constant 0 : i32
    return %arg0, %c0_i32 : i32, i32
  }
  func.func @transform_1(%arg0: i32) -> (i32, i32) {
    %c0_i32 = arith.constant 0 : i32
    %c0_i32_0 = arith.constant 0 : i32
    %c0_i32_1 = arith.constant 0 : i32
    return %c0_i32, %c0_i32_0 : i32, i32
  }
  func.func @transform_2(%arg0: i32) -> (i32, i32) {
    %c0_i32 = arith.constant 0 : i32
    %c0_i32_0 = arith.constant 0 : i32
    %c0_i32_1 = arith.constant 0 : i32
    return %c0_i32, %c0_i32_0 : i32, i32
  }
  func.func @transform_3(%arg0: i32) -> (i32, i32) {
    %c0_i32 = arith.constant 0 : i32
    %c0_i32_0 = arith.constant 0 : i32
    %c0_i32_1 = arith.constant 0 : i32
    return %c0_i32, %c0_i32_0 : i32, i32
  }
  func.func @transform_4(%arg0: i32) -> (i32, i32) {
    %c0_i32 = arith.constant 0 : i32
    %c0_i32_0 = arith.constant 0 : i32
    return %arg0, %c0_i32 : i32, i32
  }
}

</mosaic_0001>

<bundles_post_ra>
// kernel: layer_norm.1
= control target key start
LH: loop header
LB: loop body
LE: loop exit
PB: predicated region body
PF: predicated region fallthrough
CT: control target
= control target key end

     0   :  { %v397_v3 = vmov 0.0|0.0   ;;  %vm398_vm0 = vmmov 0   ;;  %v399_v6 = vmov 0.0   ;;  %s485_s0 = inlined_call_operand.vmem [shape: f32[4,128], index: 0, kind: input, shape index: {}]   ;;  %s486_s1 = inlined_call_operand.vmem [shape: f32[1,128], index: 1, kind: input, shape index: {}]   ;;  %s487_s2 = inlined_call_operand.vmem [shape: f32[1,128], index: 2, kind: input, shape index: {}]   ;;  %s488_s3 = inlined_call_operand.vmem [shape: f32[128,128], index: 3, kind: input, shape index: {}]   ;;  %s489_s4 = inlined_call_operand.vmem [shape: f32[4,128], index: 4, kind: output, shape index: {}]  }
   0x1   :  { %v18_v0 = vld [vmem:[%s488_s3] sm:$0xff]  ;;  %v19_v1 = vld [vmem:[%s488_s3 + $0x8] sm:$0xff]  ;;  %v20_v2 = vld [vmem:[%s488_s3 + $0x10] sm:$0xff]  ;;  %344 = vmatprep.subr.bf16.mxu0 %v397_v3  ;;  %368 = vmatprep.subr.bf16.mxu1 %v397_v3 }
   0x2   :  { %v345_v4 = vpack.c.bf16 %v19_v1, %v18_v0  ;;  %v21_v5 = vld [vmem:[%s488_s3 + $0x18] sm:$0xff]  ;;  %306 = vmatprep.mubr.msk.f32.mxu0 %vm398_vm0, %v399_v6  ;;  %341 = vmatprep.mubr.msk.f32.mxu1 %vm398_vm0, %v399_v6  ;;  %v22_v8 = vld [vmem:[%s488_s3 + $0x20] sm:$0xff]  ;;  %v23_v9 = vld [vmem:[%s488_s3 + $0x28] sm:$0xff] }
   0x3   :  { %v348_v7 = vpack.c.bf16 %v21_v5, %v20_v2  ;;  %v351_v10 = vpack.c.bf16 %v23_v9, %v22_v8  ;;  %v24_v11 = vld [vmem:[%s488_s3 + $0x30] sm:$0xff]  ;;  %v25_v12 = vld [vmem:[%s488_s3 + $0x38] sm:$0xff]  ;;  %v26_v14 = vld [vmem:[%s488_s3 + $0x40] sm:$0xff] }
   0x4   :  { %346 = vmatpush3.bf16.msra.mxu0 %v345_v4  ;;  %370 = vmatpush3.bf16.msra.mxu1 %v345_v4  ;;  %v354_v13 = vpack.c.bf16 %v25_v12, %v24_v11  ;;  %v27_v15 = vld [vmem:[%s488_s3 + $0x48] sm:$0xff]  ;;  %v28_v17 = vld [vmem:[%s488_s3 + $0x50] sm:$0xff]  ;;  %v29_v18 = vld [vmem:[%s488_s3 + $0x58] sm:$0xff] }
   0x5   :  { %347 = vmatprep.subr.bf16.mxu0 %v397_v3  ;;  %371 = vmatprep.subr.bf16.mxu1 %v397_v3  ;;  %v357_v16 = vpack.c.bf16 %v27_v15, %v26_v14  ;;  %v360_v19 = vpack.c.bf16 %v29_v18, %v28_v17  ;;  %v30_v20 = vld [vmem:[%s488_s3 + $0x60] sm:$0xff]  ;;  %v31_v21 = vld [vmem:[%s488_s3 + $0x68] sm:$0xff]  ;;  %v32_v23 = vld [vmem:[%s488_s3 + $0x70] sm:$0xff] }
   0x6   :  { %v363_v22 = vpack.c.bf16 %v31_v21, %v30_v20  ;;  %v33_v24 = vld [vmem:[%s488_s3 + $0x78] sm:$0xff]  ;;  %v17_v26 = vld [vmem:[%s485_s0] sm:$0xff] }
   0x7   :  { %v366_v25 = vpack.c.bf16 %v33_v24, %v32_v23  ;;  %v104_v27 = vmul.f32 %v17_v26, %v17_v26  ;;  %v238_v38 = vld [vmem:[%s486_s1] ss:$0 sm:$0xff] }
   0x8   :  { %349 = vmatpush3.bf16.msra.mxu0 %v348_v7  ;;  %373 = vmatpush3.bf16.msra.mxu1 %v348_v7  ;;  %v239_v40 = vld [vmem:[%s487_s2] ss:$0 sm:$0xff] }
   0x9   :  { %350 = vmatprep.subr.bf16.mxu0 %v397_v3  ;;  %374 = vmatprep.subr.bf16.mxu1 %v397_v3 }
   0xc   :  { %352 = vmatpush3.bf16.msra.mxu0 %v351_v10  ;;  %376 = vmatpush3.bf16.msra.mxu1 %v351_v10 }
   0xd   :  { %353 = vmatprep.subr.bf16.mxu0 %v397_v3  ;;  %377 = vmatprep.subr.bf16.mxu1 %v397_v3 }
  0x10   :  { %355 = vmatpush3.bf16.msra.mxu0 %v354_v13  ;;  %379 = vmatpush3.bf16.msra.mxu1 %v354_v13 }
  0x11   :  { %356 = vmatprep.subr.bf16.mxu0 %v397_v3  ;;  %380 = vmatprep.subr.bf16.mxu1 %v397_v3 }
  0x14   :  { %358 = vmatpush3.bf16.msra.mxu0 %v357_v16  ;;  %382 = vmatpush3.bf16.msra.mxu1 %v357_v16 }
  0x15   :  { %359 = vmatprep.subr.bf16.mxu0 %v397_v3  ;;  %383 = vmatprep.subr.bf16.mxu1 %v397_v3 }
  0x18   :  { %361 = vmatpush3.bf16.msra.mxu0 %v360_v19  ;;  %385 = vmatpush3.bf16.msra.mxu1 %v360_v19 }
  0x19   :  { %362 = vmatprep.subr.bf16.mxu0 %v397_v3  ;;  %386 = vmatprep.subr.bf16.mxu1 %v397_v3 }
  0x1c   :  { %364 = vmatpush3.bf16.msra.mxu0 %v363_v22  ;;  %388 = vmatpush3.bf16.msra.mxu1 %v363_v22 }
  0x1d   :  { %365 = vmatprep.subr.bf16.mxu0 %v397_v3  ;;  %389 = vmatprep.subr.bf16.mxu1 %v397_v3 }
  0x20   :  { %367 = vmatpush3.bf16.msra.mxu0 %v366_v25  ;;  %391 = vmatpush3.bf16.msra.mxu1 %v366_v25 }
  0x23   :  { %307 = vmatmul.mubr.f32.vlgmr.msra.gmra.mrb[0].mxu0 %v17_v26  ;;  %342 = vmatmul.mubr.f32.vlgmr.msra.gmra.mrb[0].mxu1 %v104_v27 }
  0xf6   :  { %v100_v28 = vpop.f32.mrb[0].mxu0  ;;  %v171_v29 = vpop.f32.mrb[0].mxu1 }
  0xf7   :  { %v175_v30 = vmul.f32 %v100_v28, %v100_v28  ;;  %v308_v31 = vpop.f32.mrb[1].mxu0  ;;  %v343_v32 = vpop.f32.mrb[1].mxu1  ;;  %v178_v36 = vsub.f32 %v17_v26, %v100_v28 }
  0xf9   :  { %v176_v33 = vsub.f32 %v171_v29, %v175_v30 }
  0xfb   :  { %v177_v34 = vmax.f32 %v176_v33, 0.0 }
  0xfd   :  { %v179_v35 = vadd.f32 1e-05, %v177_v34 }
  0xff   :  { %395 = vrsqrt.f32 %v179_v35 }
 0x109   :  { %v396_v37 = vpop.eup %395 }
 0x10a   :  { %v181_v39 = vmul.f32 %v396_v37, %v178_v36 }
 0x10c   :  { %v189_v41 = vmul.f32 %v238_v38, %v181_v39 }
 0x10e   :  { %v197_v42 = vadd.f32 %v239_v40, %v189_v41 }
 0x110   :  { %198 = vst [vmem:[#allocation2] sm:$0xff] %v197_v42 }
 0x117   :  { %v216_v43 = vld [vmem:[#allocation2] sm:$0xf] }
 0x118   :  { %217 = vst [vmem:[%s489_s4] sm:$0xf] %v216_v43 }

</bundles_post_ra>
